<compile_context>
chip_gen: v6e
topology: v6e:2x2x1
jax: 0.10.0
libtpu: 0.0.40
codegen_flags: <defaults>
</compile_context>

<pallas_src>
import jax
import jax.numpy as jnp
from jax.experimental import pallas as pl
from jax.experimental.pallas import tpu as pltpu

HIDDEN1 = 50
HIDDEN2 = 20
H_PAD = 128            # hidden dims padded to one 128-lane tile (VMEM-resident)
SUBLANE = 8            # f32 sublane count -> output-row padding


def _round_up(n, m):
    return ((n + m - 1) // m) * m


def dqn_kernel(x_ref, w1_ref, b1_ref, w2_ref, b2_ref, w3_ref, b3_ref, o_ref):
    # Hoist bias loads once at kernel entry.
    b1 = b1_ref[...]
    b2 = b2_ref[...]
    b3 = b3_ref[...]
    # fc1 + ReLU: bf16 operands on the MXU (K = input_dim, unpadded), f32 acc.
    h1 = jnp.dot(x_ref[...], w1_ref[...], preferred_element_type=jnp.float32)
    h1 = jnp.maximum(h1 + b1, 0.0)
    # fc2 + ReLU
    h2 = jnp.dot(h1.astype(jnp.bfloat16), w2_ref[...],
                 preferred_element_type=jnp.float32)
    h2 = jnp.maximum(h2 + b2, 0.0)
    # fc3 (no activation)
    out = jnp.dot(h2.astype(jnp.bfloat16), w3_ref[...],
                  preferred_element_type=jnp.float32)
    out = out + b3                                   # (tb, 128) f32
    # Transpose on the XLU so the HBM store is (out_rows, tb): lane axis is the
    # dense batch dim and only the few real Q-value rows are written back.
    out_t = out.T                                    # (128, tb) f32
    o_ref[...] = out_t[: o_ref.shape[0], :].astype(o_ref.dtype)


def init_params(key, input_dim, output_dim):
    """nn.Linear-style init (uniform +-1/sqrt(fan_in)).
    Weights are stored TRANSPOSED: (in_features, out_features)."""
    dims = [(input_dim, HIDDEN1), (HIDDEN1, HIDDEN2), (HIDDEN2, output_dim)]
    params = {}
    for i, (fan_in, fan_out) in enumerate(dims, start=1):
        key, kw, kb = jax.random.split(key, 3)
        bound = 1.0 / jnp.sqrt(fan_in)
        params[f"w{i}"] = jax.random.uniform(
            kw, (fan_in, fan_out), jnp.float32, -bound, bound)
        # bias kept 2D (1, fan_out) so it broadcasts cleanly inside the kernel
        params[f"b{i}"] = jax.random.uniform(
            kb, (1, fan_out), jnp.float32, -bound, bound)
    return params


def prepare_params(params):
    """Pad HIDDEN dims (and fc3 output lanes) to 128 and cast weights to bf16.
    The INPUT feature dim of w1 stays unpadded (matches the unpadded x DMA).
    Padding is exact: padded bias entries are 0 and ReLU(0)=0, so padded
    rows/cols contribute nothing."""
    padded = {}
    in_dim = params["w1"].shape[0]
    pad_to = {1: (in_dim, H_PAD), 2: (H_PAD, H_PAD), 3: (H_PAD, H_PAD)}
    for i in (1, 2, 3):
        w = params[f"w{i}"]
        b = params[f"b{i}"]
        fi, fo = w.shape
        fi_p, fo_p = pad_to[i]
        padded[f"w{i}"] = jnp.pad(
            w, ((0, fi_p - fi), (0, fo_p - fo))).astype(jnp.bfloat16)
        padded[f"b{i}"] = jnp.pad(b, ((0, 0), (0, fo_p - fo)))  # f32
    return padded


def _choose_batch_tile(B):
    """Tile the batch so per-step overhead (~0.35us) is amortized while v7x's
    two TensorCores both get work for mid/large batches."""
    if B >= 512:
        tb = min(2048, max(256, _round_up((B + 3) // 4, 256)))
        b_pad = _round_up(B, tb)
    else:
        # single tile; pad to 16 rows = one full packed bf16 (16,128) vreg tile
        b_pad = _round_up(max(B, 1), 16)
        tb = b_pad
    return tb, b_pad


def dqn_forward(x, padded_params, output_dim):
    """x: (B, input_dim). padded_params: output of prepare_params."""
    w1, b1 = padded_params["w1"], padded_params["b1"]
    w2, b2 = padded_params["w2"], padded_params["b2"]
    w3, b3 = padded_params["w3"], padded_params["b3"]

    x = x.astype(jnp.float32)  # mirrors the module's x.float()
    B, in_dim = x.shape
    assert in_dim == w1.shape[0]
    out_rows = _round_up(output_dim, SUBLANE)   # real Q rows + a few pad rows

    tb, b_pad = _choose_batch_tile(B)
    grid = (b_pad // tb,)

    # Only the batch axis is padded; feature axis stays at input_dim.
    x_p = jnp.pad(x, ((0, b_pad - B), (0, 0))).astype(jnp.bfloat16)

    flops = 2 * B * (in_dim * HIDDEN1 + HIDDEN1 * HIDDEN2 + HIDDEN2 * output_dim)
    bytes_accessed = int(
        x_p.size * x_p.dtype.itemsize
        + sum(int(p.size) * p.dtype.itemsize for p in (w1, w2, w3, b1, b2, b3))
        + out_rows * b_pad * 4)

    out_t = pl.pallas_call(
        dqn_kernel,
        out_shape=jax.ShapeDtypeStruct((out_rows, b_pad), jnp.float32),
        grid=grid,
        in_specs=[
            pl.BlockSpec((tb, in_dim), lambda i: (i, 0)),   # x: tiled on batch
            pl.BlockSpec(w1.shape, lambda i: (0, 0)),       # weights/biases:
            pl.BlockSpec(b1.shape, lambda i: (0, 0)),       # constant index_map
            pl.BlockSpec(w2.shape, lambda i: (0, 0)),       # -> VMEM-resident
            pl.BlockSpec(b2.shape, lambda i: (0, 0)),
            pl.BlockSpec(w3.shape, lambda i: (0, 0)),
            pl.BlockSpec(b3.shape, lambda i: (0, 0)),
        ],
        # Transposed output: lane axis = batch (dense, unmasked stores for
        # tb that is a multiple of 128), only `out_rows` f32 rows per tile.
        out_specs=pl.BlockSpec((out_rows, tb), lambda i: (0, i)),
        compiler_params=pltpu.CompilerParams(
            dimension_semantics=("parallel",)),
        cost_estimate=pl.CostEstimate(
            flops=flops, transcendentals=0, bytes_accessed=bytes_accessed),
    )(x_p, w1, b1, w2, b2, w3, b3)

    # (out_rows, b_pad) -> (B, output_dim)
    return out_t[:output_dim, :B].T


if __name__ == "__main__":
    key = jax.random.PRNGKey(0)
    batch, input_dim, output_dim = 8, 16, 4

    key, kx = jax.random.split(key)
    x = jax.random.normal(kx, (batch, input_dim), jnp.float32)
    params = init_params(key, input_dim, output_dim)
    padded_params = prepare_params(params)

    out = dqn_forward(x, padded_params, output_dim)
    jax.block_until_ready(out)

    # reference check in plain JAX (f32, original unpadded shapes)
    def ref(x, p):
        h = jnp.maximum(x @ p["w1"] + p["b1"], 0.0)
        h = jnp.maximum(h @ p["w2"] + p["b2"], 0.0)
        return h @ p["w3"] + p["b3"]

    expected = ref(x, params)
    assert out.shape == (batch, output_dim)
    # bf16 MXU operands with f32 accumulation -> loosened tolerance vs f32 ref.
    # TODO(synk): if this forward feeds a TD-error loss, switch x/W to an f32
    # MXU path (compute cost is negligible; only input DMA doubles).
    max_err = float(jnp.max(jnp.abs(out - expected)))
    assert jnp.allclose(out, expected, atol=5e-2, rtol=5e-2), max_err
    print("KERNEL_OK")
</pallas_src>

<mosaic_0001>
module attributes {stable_mosaic.version = 11 : i64} {
  func.func @dqn_kernel(%arg0: i32, %arg1: memref<16x16xbf16, #tpu.memory_space<vmem>>, %arg2: memref<16x128xbf16, #tpu.memory_space<vmem>>, %arg3: memref<1x128xf32, #tpu.memory_space<vmem>>, %arg4: memref<128x128xbf16, #tpu.memory_space<vmem>>, %arg5: memref<1x128xf32, #tpu.memory_space<vmem>>, %arg6: memref<128x128xbf16, #tpu.memory_space<vmem>>, %arg7: memref<1x128xf32, #tpu.memory_space<vmem>>, %arg8: memref<8x16xf32, #tpu.memory_space<vmem>>) attributes {dimension_semantics = [#tpu.dimension_semantics<parallel>], iteration_bounds = array<i64: 1>, scalar_prefetch = 0 : i64, scratch_operands = 0 : i64, tpu.core_type = #tpu.core_type<tc>, window_params = [{transform_indices = @transform_0, window_bounds = array<i64: 16, 16>}, {pipeline_mode = #tpu.pipeline_mode<synchronous>, transform_indices = @transform_1, window_bounds = array<i64: 16, 128>}, {pipeline_mode = #tpu.pipeline_mode<synchronous>, transform_indices = @transform_2, window_bounds = array<i64: 1, 128>}, {pipeline_mode = #tpu.pipeline_mode<synchronous>, transform_indices = @transform_3, window_bounds = array<i64: 128, 128>}, {pipeline_mode = #tpu.pipeline_mode<synchronous>, transform_indices = @transform_4, window_bounds = array<i64: 1, 128>}, {pipeline_mode = #tpu.pipeline_mode<synchronous>, transform_indices = @transform_5, window_bounds = array<i64: 128, 128>}, {pipeline_mode = #tpu.pipeline_mode<synchronous>, transform_indices = @transform_6, window_bounds = array<i64: 1, 128>}, {transform_indices = @transform_7, window_bounds = array<i64: 8, 16>}]} {
    %c0 = arith.constant 0 : index
    %c0_0 = arith.constant 0 : index
    %0 = vector.load %arg3[%c0, %c0_0] : memref<1x128xf32, #tpu.memory_space<vmem>>, vector<1x128xf32>
    %c0_1 = arith.constant 0 : index
    %c0_2 = arith.constant 0 : index
    %1 = vector.load %arg5[%c0_1, %c0_2] : memref<1x128xf32, #tpu.memory_space<vmem>>, vector<1x128xf32>
    %c0_3 = arith.constant 0 : index
    %c0_4 = arith.constant 0 : index
    %2 = vector.load %arg7[%c0_3, %c0_4] : memref<1x128xf32, #tpu.memory_space<vmem>>, vector<1x128xf32>
    %c0_5 = arith.constant 0 : index
    %c0_6 = arith.constant 0 : index
    %3 = vector.load %arg1[%c0_5, %c0_6] : memref<16x16xbf16, #tpu.memory_space<vmem>>, vector<16x16xbf16>
    %c0_7 = arith.constant 0 : index
    %c0_8 = arith.constant 0 : index
    %4 = vector.load %arg2[%c0_7, %c0_8] : memref<16x128xbf16, #tpu.memory_space<vmem>>, vector<16x128xbf16>
    %cst = arith.constant dense<0.000000e+00> : vector<16x128xf32>
    %5 = tpu.matmul %3, %4, %cst {dimension_numbers = #tpu.dot_dimension_numbers<[1], [0], [0], [1], [0, 0, 1, 1], [], []>} : vector<16x16xbf16>, vector<16x128xbf16>, vector<16x128xf32> -> vector<16x128xf32>
    %6 = vector.broadcast %0 : vector<1x128xf32> to vector<16x128xf32>
    %7 = arith.addf %5, %6 : vector<16x128xf32>
    %cst_9 = arith.constant 0.000000e+00 : f32
    %8 = vector.broadcast %cst_9 : f32 to vector<16x128xf32>
    %9 = arith.maximumf %7, %8 : vector<16x128xf32>
    %10 = arith.truncf %9 : vector<16x128xf32> to vector<16x128xbf16>
    %c0_10 = arith.constant 0 : index
    %c0_11 = arith.constant 0 : index
    %11 = vector.load %arg4[%c0_10, %c0_11] : memref<128x128xbf16, #tpu.memory_space<vmem>>, vector<128x128xbf16>
    %cst_12 = arith.constant dense<0.000000e+00> : vector<16x128xf32>
    %12 = tpu.matmul %10, %11, %cst_12 {dimension_numbers = #tpu.dot_dimension_numbers<[1], [0], [0], [1], [0, 0, 1, 1], [], []>} : vector<16x128xbf16>, vector<128x128xbf16>, vector<16x128xf32> -> vector<16x128xf32>
    %13 = vector.broadcast %1 : vector<1x128xf32> to vector<16x128xf32>
    %14 = arith.addf %12, %13 : vector<16x128xf32>
    %cst_13 = arith.constant 0.000000e+00 : f32
    %15 = vector.broadcast %cst_13 : f32 to vector<16x128xf32>
    %16 = arith.maximumf %14, %15 : vector<16x128xf32>
    %17 = arith.truncf %16 : vector<16x128xf32> to vector<16x128xbf16>
    %c0_14 = arith.constant 0 : index
    %c0_15 = arith.constant 0 : index
    %18 = vector.load %arg6[%c0_14, %c0_15] : memref<128x128xbf16, #tpu.memory_space<vmem>>, vector<128x128xbf16>
    %cst_16 = arith.constant dense<0.000000e+00> : vector<16x128xf32>
    %19 = tpu.matmul %17, %18, %cst_16 {dimension_numbers = #tpu.dot_dimension_numbers<[1], [0], [0], [1], [0, 0, 1, 1], [], []>} : vector<16x128xbf16>, vector<128x128xbf16>, vector<16x128xf32> -> vector<16x128xf32>
    %20 = vector.broadcast %2 : vector<1x128xf32> to vector<16x128xf32>
    %21 = arith.addf %19, %20 : vector<16x128xf32>
    %22 = tpu.transpose %21, [1, 0] : vector<16x128xf32> -> vector<128x16xf32>
    %23 = vector.extract_strided_slice %22 {offsets = [0, 0], sizes = [8, 16], strides = [1, 1]} : vector<128x16xf32> to vector<8x16xf32>
    %c0_17 = arith.constant 0 : index
    %c0_18 = arith.constant 0 : index
    %24 = vector.load %arg8[%c0_17, %c0_18] : memref<8x16xf32, #tpu.memory_space<vmem>>, vector<8x16xf32>
    tpu.vector_store %arg8[%c0_17, %c0_18], %23 {strides = array<i32>} : memref<8x16xf32, #tpu.memory_space<vmem>>, vector<8x16xf32>,
    return
  }
  func.func @transform_0(%arg0: i32) -> (i32, i32) {
    %c0_i32 = arith.constant 0 : i32
    %c0_i32_0 = arith.constant 0 : i32
    return %arg0, %c0_i32 : i32, i32
  }
  func.func @transform_1(%arg0: i32) -> (i32, i32) {
    %c0_i32 = arith.constant 0 : i32
    %c0_i32_0 = arith.constant 0 : i32
    %c0_i32_1 = arith.constant 0 : i32
    return %c0_i32, %c0_i32_0 : i32, i32
  }
  func.func @transform_2(%arg0: i32) -> (i32, i32) {
    %c0_i32 = arith.constant 0 : i32
    %c0_i32_0 = arith.constant 0 : i32
    %c0_i32_1 = arith.constant 0 : i32
    return %c0_i32, %c0_i32_0 : i32, i32
  }
  func.func @transform_3(%arg0: i32) -> (i32, i32) {
    %c0_i32 = arith.constant 0 : i32
    %c0_i32_0 = arith.constant 0 : i32
    %c0_i32_1 = arith.constant 0 : i32
    return %c0_i32, %c0_i32_0 : i32, i32
  }
  func.func @transform_4(%arg0: i32) -> (i32, i32) {
    %c0_i32 = arith.constant 0 : i32
    %c0_i32_0 = arith.constant 0 : i32
    %c0_i32_1 = arith.constant 0 : i32
    return %c0_i32, %c0_i32_0 : i32, i32
  }
  func.func @transform_5(%arg0: i32) -> (i32, i32) {
    %c0_i32 = arith.constant 0 : i32
    %c0_i32_0 = arith.constant 0 : i32
    %c0_i32_1 = arith.constant 0 : i32
    return %c0_i32, %c0_i32_0 : i32, i32
  }
  func.func @transform_6(%arg0: i32) -> (i32, i32) {
    %c0_i32 = arith.constant 0 : i32
    %c0_i32_0 = arith.constant 0 : i32
    %c0_i32_1 = arith.constant 0 : i32
    return %c0_i32, %c0_i32_0 : i32, i32
  }
  func.func @transform_7(%arg0: i32) -> (i32, i32) {
    %c0_i32 = arith.constant 0 : i32
    %c0_i32_0 = arith.constant 0 : i32
    return %c0_i32, %arg0 : i32, i32
  }
}

</mosaic_0001>

<bundles_post_ra>
// kernel: tpu_custom_call.1
= control target key start
LH: loop header
LB: loop body
LE: loop exit
PB: predicated region body
PF: predicated region fallthrough
CT: control target
= control target key end

     0   :  { %12 = vsyncpa [#allocation3], 0  ;;  %s760_s0 = inlined_call_operand.hbm [shape: bf16[16,16], index: 0, kind: input, shape index: {}]   ;;  %s761_s1 = inlined_call_operand.hbm [shape: bf16[16,128], index: 1, kind: input, shape index: {}]   ;;  %s762_s2 = inlined_call_operand.vmem [shape: f32[1,128], index: 2, kind: input, shape index: {}]   ;;  %s763_s3 = inlined_call_operand.hbm [shape: bf16[128,128], index: 3, kind: input, shape index: {}]   ;;  %s764_s4 = inlined_call_operand.vmem [shape: f32[1,128], index: 4, kind: input, shape index: {}]   ;;  %s765_s5 = inlined_call_operand.hbm [shape: bf16[128,128], index: 5, kind: input, shape index: {}]   ;;  %s766_s6 = inlined_call_operand.vmem [shape: f32[1,128], index: 6, kind: input, shape index: {}]   ;;  %s767_s7 = inlined_call_operand.hbm [shape: f32[8,16], index: 7, kind: output, shape index: {}]  }
   0x1   :  { %13 = vsyncpa [#allocation6], 0 }
   0x2   :  { %14 = vsyncpa [#allocation9], 0 }
   0x3   :  { %15 = vsyncpa [#allocation4], 0  ;;  %s653_s24 = smov [#allocation5]   ;;  %s654_s26 = smov [#allocation2]  }
   0x4   :  { %s33_s25 = sshll.u32 %s653_s24, 4  ;;  %s21_s27 = sshll.u32 %s654_s26, 4  ;;  %s34_s25 = int_to_ptr.vmem [resolvable:$true] %s33_s25  ;;  %s22_s27 = int_to_ptr.vmem [resolvable:$true] %s21_s27 }
   0x5   :  { %s553_s28 = scalar_lea.vmem %s34_s25, 128  ;;  %p558_p1 = scmp.lt.s32.totalorder %s34_s25, %s34_s25 }
   0x6   :  { %p554_p0 = scmp.ne.s32.totalorder %s34_s25, %s553_s28  ;;  %p559_p2 = scmp.lt.s32.totalorder %s553_s28, %s553_s28 }
   0x8   :  { %p560_p3 = por %p559_p2, %p558_p1 }
   0xa   :  { %p561_p4 = pnand %p560_p3, %p554_p0 }
   0xc   :  { %564 = shalt.err (!%p561_p4)
}
   0xd   :  { %s655_s29 = smov 64   ;;  %s656_s30 = smov 4  }
   0xe   :  { %39 = dma.hbm_to_vmem [thread:$0]  %s761_s1, 128, %s34_s25, [#allocation6], %s655_s29, %s655_s29, %s656_s30  }
   0xf   :  { %s573_s10 = scalar_lea.vmem %s22_s27, 128  ;;  %p578_p6 = scmp.lt.s32.totalorder %s22_s27, %s22_s27 }
  0x10   :  { %p574_p5 = scmp.ne.s32.totalorder %s22_s27, %s573_s10  ;;  %p579_p7 = scmp.lt.s32.totalorder %s573_s10, %s573_s10 }
  0x12   :  { %p580_p8 = por %p579_p7, %p578_p6 }
  0x14   :  { %p581_p9 = pnand %p580_p8, %p574_p5 }
  0x16   :  { %584 = shalt.err (!%p581_p9)
}
  0x17   :  { %27 = dma.hbm_to_vmem [thread:$0]  %s760_s0, 128, %s22_s27, [#allocation3], %s655_s29, %s655_s29, %s656_s30  }
  0x18   :  { %s657_s13 = smov [#allocation7]   ;;  %s658_s15 = smov [#allocation8]  }
  0x19   :  { %s47_s14 = sshll.u32 %s657_s13, 4  ;;  %s61_s16 = sshll.u32 %s658_s15, 4  ;;  %s48_s14 = int_to_ptr.vmem [resolvable:$true] %s47_s14  ;;  %s62_s16 = int_to_ptr.vmem [resolvable:$true] %s61_s16 }
  0x1a   :  { %s593_s1 = scalar_lea.vmem %s48_s14, 1024  ;;  %p598_p11 = scmp.lt.s32.totalorder %s48_s14, %s48_s14 }
  0x1b   :  { %p594_p10 = scmp.ne.s32.totalorder %s48_s14, %s593_s1  ;;  %p599_p12 = scmp.lt.s32.totalorder %s593_s1, %s593_s1 }
  0x1d   :  { %p600_p13 = por %p599_p12, %p598_p11 }
  0x1f   :  { %p601_p0 = pnand %p600_p13, %p594_p10 }
  0x21   :  { %604 = shalt.err (!%p601_p0)
}
  0x22   :  { %53 = dma.hbm_to_vmem [thread:$0]  %s763_s3, 1024, %s48_s14, [#allocation6], %s655_s29, %s655_s29, %s656_s30  }
  0x23   :  { %s613_s0 = scalar_lea.vmem %s62_s16, 1024  ;;  %p618_p2 = scmp.lt.s32.totalorder %s62_s16, %s62_s16 }
  0x24   :  { %p614_p1 = scmp.ne.s32.totalorder %s62_s16, %s613_s0  ;;  %p619_p3 = scmp.lt.s32.totalorder %s613_s0, %s613_s0 }
  0x26   :  { %p620_p4 = por %p619_p3, %p618_p2 }
  0x28   :  { %p621_p5 = pnand %p620_p4, %p614_p1 }
  0x2a   :  { %624 = shalt.err (!%p621_p5)
}
  0x2b   :  { %67 = dma.hbm_to_vmem [thread:$0]  %s765_s5, 1024, %s62_s16, [#allocation9], %s655_s29, %s655_s29, %s656_s30  }
  0x2c   :  { %645 = dma.done.wait [#allocation3], 128  }
  0x2d   :  { %646 = vsyncadd [#allocation3], 4294967168 }
  0x2e   :  { %647 = dma.done.wait [#allocation6], 1152  }
  0x2f   :  { %648 = vsyncadd [#allocation6], 4294966144 }
  0x30   :  { %649 = dma.done.wait [#allocation9], 1024  }
  0x31   :  { %650 = vsyncadd [#allocation9], 4294966272  ;;  %v659_v0 = vmov 0.0   ;;  %vm660_vm0 = vmmov 0   ;;  %v527_v1 = vld [vmem:[#allocation5] sm:$0xff]   ;;  %v528_v2 = vld [vmem:[#allocation2] sm:$0xff]  }
  0x32   :  { %472 = vmatprep.subr.bf16.mxu0 %v659_v0  ;;  %474 = vmatprep.mubr.msk.bf16.mxu0 %vm660_vm0, %v659_v0  ;;  %vm107_vm1 = vcmask 130048   ;;  %v529_v3 = vld [vmem:[#allocation7 + $0x38] sm:$0xff]   ;;  %v530_v4 = vld [vmem:[#allocation7 + $0x30] sm:$0xff]   ;;  %v531_v5 = vld [vmem:[#allocation7 + $0x28] sm:$0xff]  }
  0x33   :  { %478 = vmatprep.subr.bf16.mxu1 %v659_v0  ;;  %494 = vmatprep.mubr.msk.bf16.mxu1 %vm660_vm0, %v659_v0  ;;  %v532_v6 = vld [vmem:[#allocation7 + $0x20] sm:$0xff]   ;;  %v533_v7 = vld [vmem:[#allocation7 + $0x18] sm:$0xff]   ;;  %v534_v8 = vld [vmem:[#allocation7 + $0x10] sm:$0xff]  }
  0x34   :  { %473 = vmatpush3.bf16.msra.mxu0 %v527_v1  ;;  %479 = vmatpush3.bf16.msra.mxu1 %v529_v3  ;;  %v535_v9 = vld [vmem:[#allocation7 + $0x8] sm:$0xff]   ;;  %v536_v10 = vld [vmem:[#allocation7] sm:$0xff]   ;;  %v537_v11 = vld [vmem:[#allocation8 + $0x38] sm:$0xff]  }
  0x35   :  { %498 = vmatprep.subr.bf16.mxu0 %v659_v0  ;;  %480 = vmatprep.subr.bf16.mxu1 %v659_v0  ;;  %v538_v12 = vld [vmem:[#allocation8 + $0x30] sm:$0xff]   ;;  %v539_v13 = vld [vmem:[#allocation8 + $0x28] sm:$0xff]   ;;  %v540_v14 = vld [vmem:[#allocation8 + $0x20] sm:$0xff]  }
  0x36   :  { %v541_v15 = vld [vmem:[#allocation8 + $0x18] sm:$0xff]   ;;  %v430_v16 = vld [vmem:[%s762_s2] ss:$0 sm:$0xff]  ;;  %v543_v27 = vld [vmem:[#allocation8 + $0x8] sm:$0xff]  }
  0x37   :  { %475 = vmatmul.mubr.msk.bf16.vlgmr.msra.gmra.mxu0 %vm107_vm1, %v528_v2  ;;  %v542_v26 = vld [vmem:[#allocation8 + $0x10] sm:$0xff]   ;;  %v544_v28 = vld [vmem:[#allocation8] sm:$0xff]  }
  0x38   :  { %514 = vmatprep.mubr.msk.bf16.mxu0 %vm660_vm0, %v659_v0  ;;  %481 = vmatpush3.bf16.msra.mxu1 %v530_v4  ;;  %v434_v29 = vld [vmem:[%s764_s4] ss:$0 sm:$0xff]  ;;  %s661_s4 = smov [#allocation10]  }
  0x39   :  { %482 = vmatprep.subr.bf16.mxu1 %v659_v0  ;;  %499 = vmatpush3.bf16.msra.mxu0 %v537_v11  ;;  %v443_v39 = vld [vmem:[%s766_s6] ss:$0 sm:$0xff]  ;;  %s419_s24 = sshll.u32 %s661_s4, 4  ;;  %s420_s24 = int_to_ptr.vmem [resolvable:$true] %s419_s24 }
  0x3a   :  { %500 = vmatprep.subr.bf16.mxu0 %v659_v0  ;;  %s625_s25 = scalar_lea.vmem %s420_s24, 128  ;;  %p630_p7 = scmp.lt.s32.totalorder %s420_s24, %s420_s24 }
  0x3b   :  { %p626_p6 = scmp.ne.s32.totalorder %s420_s24, %s625_s25  ;;  %p631_p8 = scmp.lt.s32.totalorder %s625_s25, %s625_s25 }
  0x3c   :  { %483 = vmatpush3.bf16.msra.mxu1 %v531_v5 }
  0x3d   :  { %484 = vmatprep.subr.bf16.mxu1 %v659_v0  ;;  %501 = vmatpush3.bf16.msra.mxu0 %v538_v12  ;;  %p632_p9 = por %p631_p8, %p630_p7 }
  0x3e   :  { %502 = vmatprep.subr.bf16.mxu0 %v659_v0 }
  0x3f   :  { %p633_p10 = pnand %p632_p9, %p626_p6 }
  0x40   :  { %485 = vmatpush3.bf16.msra.mxu1 %v532_v6 }
  0x41   :  { %486 = vmatprep.subr.bf16.mxu1 %v659_v0  ;;  %503 = vmatpush3.bf16.msra.mxu0 %v539_v13 }
  0x42   :  { %504 = vmatprep.subr.bf16.mxu0 %v659_v0 }
  0x44   :  { %487 = vmatpush3.bf16.msra.mxu1 %v533_v7 }
  0x45   :  { %488 = vmatprep.subr.bf16.mxu1 %v659_v0  ;;  %505 = vmatpush3.bf16.msra.mxu0 %v540_v14 }
  0x46   :  { %506 = vmatprep.subr.bf16.mxu0 %v659_v0 }
  0x48   :  { %489 = vmatpush3.bf16.msra.mxu1 %v534_v8 }
  0x49   :  { %490 = vmatprep.subr.bf16.mxu1 %v659_v0  ;;  %507 = vmatpush3.bf16.msra.mxu0 %v541_v15 }
  0x4a   :  { %508 = vmatprep.subr.bf16.mxu0 %v659_v0 }
  0x4c   :  { %491 = vmatpush3.bf16.msra.mxu1 %v535_v9 }
  0x4d   :  { %492 = vmatprep.subr.bf16.mxu1 %v659_v0  ;;  %509 = vmatpush3.bf16.msra.mxu0 %v542_v26 }
  0x4e   :  { %510 = vmatprep.subr.bf16.mxu0 %v659_v0 }
  0x50   :  { %493 = vmatpush3.bf16.msra.mxu1 %v536_v10 }
  0x51   :  { %511 = vmatpush3.bf16.msra.mxu0 %v543_v27 }
  0x52   :  { %512 = vmatprep.subr.bf16.mxu0 %v659_v0 }
  0x55   :  { %513 = vmatpush3.bf16.msra.mxu0 %v544_v28 }
  0xf7   :  { %v145_v17 = vpop.f32.mrf.mxu0 }
  0xf8   :  { %v146_v19 = vadd.f32 %v430_v16, %v145_v17 }
  0xf9   :  { %v476_v18 = vpop.f32.mrf.mxu0 }
  0xfa   :  { %v152_v23 = vmax.f32 %v146_v19, 0.0 }
  0xfb   :  { %v148_v20 = vpop.f32.mrf.mxu0 }
  0xfc   :  { %v149_v21 = vadd.f32 %v430_v16, %v148_v20 }
  0xfd   :  { %v477_v22 = vpop.f32.mrf.mxu0 }
  0xfe   :  { %v153_v24 = vmax.f32 %v149_v21, 0.0 }
 0x100   :  { %v154_v25 = vpack.c.bf16 %v153_v24, %v152_v23 }
 0x102   :  { %495 = vmatmul.mubr.bf16.vlgmr.msra.gmra.mxu1 %v154_v25 }
 0x1c2   :  { %v259_v30 = vpop.f32.mrf.mxu1 }
 0x1c3   :  { %v260_v32 = vadd.f32 %v434_v29, %v259_v30 }
 0x1c4   :  { %v496_v31 = vpop.f32.mrf.mxu1 }
 0x1c5   :  { %v266_v36 = vmax.f32 %v260_v32, 0.0 }
 0x1c6   :  { %v262_v33 = vpop.f32.mrf.mxu1 }
 0x1c7   :  { %v263_v34 = vadd.f32 %v434_v29, %v262_v33 }
 0x1c8   :  { %v497_v35 = vpop.f32.mrf.mxu1 }
 0x1c9   :  { %v267_v37 = vmax.f32 %v263_v34, 0.0 }
 0x1cb   :  { %v268_v38 = vpack.c.bf16 %v267_v37, %v266_v36 }
 0x1cd   :  { %515 = vmatmul.mubr.bf16.vlgmr.msra.gmra.mxu0 %v268_v38 }
 0x28d   :  { %v373_v40 = vpop.f32.mrf.mxu0 }
 0x28e   :  { %v374_v41 = vadd.f32 %v443_v39, %v373_v40 }
 0x28f   :  { %v516_v42 = vpop.f32.mrf.mxu0 }
 0x290   :  { %380 = vxpose.xlu0.b32.start [1/2] (short) (narrow) %v374_v41, 8 }
 0x291   :  { %v376_v43 = vpop.f32.mrf.mxu0 }
 0x292   :  { %v377_v44 = vadd.f32 %v443_v39, %v376_v43 }
 0x293   :  { %v517_v45 = vpop.f32.mrf.mxu0 }
 0x294   :  { %381 = vxpose.xlu0.b32.end [2/2] (short) (narrow) %v377_v44, 8 }
 0x30c   :  { %v396_v46 = vpop.trf.xlu0 }
 0x30d   :  { %412 = vst.msk [vmem:[#allocation10] sm:$0xff] %vm107_vm1, %v396_v46 }
 0x30e   :  { %636 = shalt.err (!%p633_p10)
}
 0x30f   :  { %422 = dma.vmem_to_hbm [thread:$0]  %s420_s24, 128, %s767_s7, [#allocation4]  }
 0x310   :  { %651 = dma.done.wait [#allocation4], 128  }
 0x311   :  { %652 = vsyncadd [#allocation4], 4294967168 }
 0x312   :  { %426 = vsyncpa [#allocation3], 1 }
 0x313   :  { %427 = vsyncpa [#allocation6], 1 }
 0x314   :  { %428 = vsyncpa [#allocation9], 1 }
 0x315   :  { %429 = vsyncpa [#allocation4], 1 }

</bundles_post_ra>
